<compile_context>
chip_gen: v7x
topology: tpu7x:2x2x1
jax: 0.10.0
libtpu: 0.0.40
codegen_flags: <defaults>
</compile_context>

<pallas_src>
import jax
import jax.numpy as jnp
from jax.experimental import pallas as pl
from jax.experimental.pallas import tpu as pltpu


def _round_up(x, m):
    return (x + m - 1) // m * m


def _net_kernel(xt_ref, w1_ref, b1_ref, w2_ref, b2_ref, o_ref):
    # xt_ref: (2, TN) f32 in VMEM (batch on lanes).
    # w1_ref: (2, 8), b1_ref: (8,), w2_ref: (8, 2), b2_ref: (2,)  -- all SMEM.
    x = xt_ref[...]
    x0 = x[0:1, :]           # (1, TN) feature 0 across the batch
    x1 = x[1:2, :]           # (1, TN) feature 1 across the batch

    acc0 = jnp.zeros_like(x0)
    acc1 = jnp.zeros_like(x0)
    # Fully unrolled layer1 + ReLU + layer2 on the VPU (scalar-broadcast FMAs).
    for j in range(8):
        h_j = jnp.maximum(
            w1_ref[0, j] * x0 + w1_ref[1, j] * x1 + b1_ref[j], 0.0
        )
        acc0 = acc0 + w2_ref[j, 0] * h_j
        acc1 = acc1 + w2_ref[j, 1] * h_j
    z0 = acc0 + b2_ref[0]
    z1 = acc1 + b2_ref[1]

    # log_softmax over the size-2 feature (sublane) axis: pure elementwise ops.
    m = jnp.maximum(z0, z1)
    e0 = jnp.exp(z0 - m)
    e1 = jnp.exp(z1 - m)
    lse = jnp.log(e0 + e1)

    # Lane-dense, unmasked row stores.
    o_ref[0:1, :] = z0 - m - lse
    o_ref[1:2, :] = z1 - m - lse


def net_forward(x, w1, b1, w2, b2, *, tile_n=1024):
    """x: (N, 2) float32. Returns (N, 2) log-probabilities (matches torch)."""
    n = x.shape[0]
    # Lane-dense tile: multiple of 128, as large as reasonable, capped by N.
    tn = min(tile_n, max(128, _round_up(n, 128)))
    n_pad = _round_up(n, tn)

    # Transpose + zero-pad so batch sits on the lane axis (layout plumbing in
    # the wrapper; padded columns are sliced off afterwards).
    xt = jnp.pad(x.astype(jnp.float32).T, ((0, 0), (0, n_pad - n)))

    smem = pl.BlockSpec(memory_space=pltpu.MemorySpace.SMEM)
    out_t = pl.pallas_call(
        _net_kernel,
        out_shape=jax.ShapeDtypeStruct((2, n_pad), jnp.float32),
        grid=(n_pad // tn,),
        in_specs=[
            pl.BlockSpec((2, tn), lambda i: (0, i)),  # x^T, pipelined over batch
            smem,  # w1 (2, 8)
            smem,  # b1 (8,)
            smem,  # w2 (8, 2)
            smem,  # b2 (2,)
        ],
        out_specs=pl.BlockSpec((2, tn), lambda i: (0, i)),
        compiler_params=pltpu.CompilerParams(
            dimension_semantics=("parallel",),
        ),
    )(xt, w1, b1, w2, b2)

    return out_t[:, :n].T


def init_params(key):
    """Deterministic init mimicking torch.nn.Linear (uniform +/- 1/sqrt(fan_in)).
    Weights are stored as (in_features, out_features); biases are 1-D."""
    k1, k2, k3, k4 = jax.random.split(key, 4)
    bound1 = 1.0 / jnp.sqrt(2.0)
    bound2 = 1.0 / jnp.sqrt(8.0)
    w1 = jax.random.uniform(k1, (2, 8), jnp.float32, -bound1, bound1)
    b1 = jax.random.uniform(k2, (8,), jnp.float32, -bound1, bound1)
    w2 = jax.random.uniform(k3, (8, 2), jnp.float32, -bound2, bound2)
    b2 = jax.random.uniform(k4, (2,), jnp.float32, -bound2, bound2)
    return w1, b1, w2, b2


def reference_forward(x, w1, b1, w2, b2):
    h = jnp.maximum(x @ w1 + b1, 0.0)
    z = h @ w2 + b2
    return jax.nn.log_softmax(z, axis=1)


if __name__ == "__main__":
    key = jax.random.PRNGKey(0)
    kx, kp = jax.random.split(key)
    w1, b1, w2, b2 = init_params(kp)

    # Small batch (single tile, padded to 128 lanes).
    batch = 8
    x = jax.random.normal(kx, (batch, 2), dtype=jnp.float32)
    out = jax.block_until_ready(net_forward(x, w1, b1, w2, b2))
    ref = reference_forward(x, w1, b1, w2, b2)
    assert out.shape == (batch, 2)
    assert jnp.allclose(out, ref, atol=1e-5, rtol=1e-5), "mismatch vs JAX reference"

    # Multi-tile path (grid=3, padding sliced off) to exercise the pipeline.
    x2 = jax.random.normal(kx, (300, 2), dtype=jnp.float32)
    out2 = jax.block_until_ready(net_forward(x2, w1, b1, w2, b2, tile_n=128))
    ref2 = reference_forward(x2, w1, b1, w2, b2)
    assert out2.shape == (300, 2)
    assert jnp.allclose(out2, ref2, atol=1e-5, rtol=1e-5), "mismatch (tiled) vs reference"

    print("KERNEL_OK")
</pallas_src>

<mosaic_0001>
module attributes {stable_mosaic.version = 11 : i64} {
  func.func @_net_kernel(%arg0: i32, %arg1: memref<2x128xf32, #tpu.memory_space<vmem>>, %arg2: memref<2x8xf32, #tpu.memory_space<smem>>, %arg3: memref<8xf32, #tpu.memory_space<smem>>, %arg4: memref<8x2xf32, #tpu.memory_space<smem>>, %arg5: memref<2xf32, #tpu.memory_space<smem>>, %arg6: memref<2x128xf32, #tpu.memory_space<vmem>>) attributes {dimension_semantics = [#tpu.dimension_semantics<parallel>], iteration_bounds = array<i64: 1>, scalar_prefetch = 0 : i64, scratch_operands = 0 : i64, tpu.core_type = #tpu.core_type<tc>, window_params = [{transform_indices = @transform_0, window_bounds = array<i64: 2, 128>}, {transform_indices = @transform_1, window_bounds = array<i64: 2, 8>}, {transform_indices = @transform_2, window_bounds = array<i64: 8>}, {transform_indices = @transform_3, window_bounds = array<i64: 8, 2>}, {transform_indices = @transform_4, window_bounds = array<i64: 2>}, {transform_indices = @transform_5, window_bounds = array<i64: 2, 128>}]} {
    %c0 = arith.constant 0 : index
    %c0_0 = arith.constant 0 : index
    %0 = vector.load %arg1[%c0, %c0_0] : memref<2x128xf32, #tpu.memory_space<vmem>>, vector<2x128xf32>
    %1 = vector.extract_strided_slice %0 {offsets = [0, 0], sizes = [1, 128], strides = [1, 1]} : vector<2x128xf32> to vector<1x128xf32>
    %2 = vector.extract_strided_slice %0 {offsets = [1, 0], sizes = [1, 128], strides = [1, 1]} : vector<2x128xf32> to vector<1x128xf32>
    %cst = arith.constant 0.000000e+00 : f32
    %3 = vector.broadcast %cst : f32 to vector<1x128xf32>
    %cst_1 = arith.constant 0.000000e+00 : f32
    %4 = vector.broadcast %cst_1 : f32 to vector<1x128xf32>
    %c0_2 = arith.constant 0 : index
    %c0_3 = arith.constant 0 : index
    %5 = memref.load %arg2[%c0_2, %c0_3] : memref<2x8xf32, #tpu.memory_space<smem>>
    %6 = vector.broadcast %5 : f32 to vector<1x128xf32>
    %7 = arith.mulf %6, %1 : vector<1x128xf32>
    %c1 = arith.constant 1 : index
    %c0_4 = arith.constant 0 : index
    %8 = memref.load %arg2[%c1, %c0_4] : memref<2x8xf32, #tpu.memory_space<smem>>
    %9 = vector.broadcast %8 : f32 to vector<1x128xf32>
    %10 = arith.mulf %9, %2 : vector<1x128xf32>
    %11 = arith.addf %7, %10 : vector<1x128xf32>
    %c0_5 = arith.constant 0 : index
    %12 = memref.load %arg3[%c0_5] : memref<8xf32, #tpu.memory_space<smem>>
    %13 = vector.broadcast %12 : f32 to vector<1x128xf32>
    %14 = arith.addf %11, %13 : vector<1x128xf32>
    %cst_6 = arith.constant 0.000000e+00 : f32
    %15 = vector.broadcast %cst_6 : f32 to vector<1x128xf32>
    %16 = arith.maximumf %14, %15 : vector<1x128xf32>
    %c0_7 = arith.constant 0 : index
    %c0_8 = arith.constant 0 : index
    %17 = memref.load %arg4[%c0_7, %c0_8] : memref<8x2xf32, #tpu.memory_space<smem>>
    %18 = vector.broadcast %17 : f32 to vector<1x128xf32>
    %19 = arith.mulf %18, %16 : vector<1x128xf32>
    %20 = arith.addf %3, %19 : vector<1x128xf32>
    %c0_9 = arith.constant 0 : index
    %c1_10 = arith.constant 1 : index
    %21 = memref.load %arg4[%c0_9, %c1_10] : memref<8x2xf32, #tpu.memory_space<smem>>
    %22 = vector.broadcast %21 : f32 to vector<1x128xf32>
    %23 = arith.mulf %22, %16 : vector<1x128xf32>
    %24 = arith.addf %4, %23 : vector<1x128xf32>
    %c0_11 = arith.constant 0 : index
    %c1_12 = arith.constant 1 : index
    %25 = memref.load %arg2[%c0_11, %c1_12] : memref<2x8xf32, #tpu.memory_space<smem>>
    %26 = vector.broadcast %25 : f32 to vector<1x128xf32>
    %27 = arith.mulf %26, %1 : vector<1x128xf32>
    %c1_13 = arith.constant 1 : index
    %c1_14 = arith.constant 1 : index
    %28 = memref.load %arg2[%c1_13, %c1_14] : memref<2x8xf32, #tpu.memory_space<smem>>
    %29 = vector.broadcast %28 : f32 to vector<1x128xf32>
    %30 = arith.mulf %29, %2 : vector<1x128xf32>
    %31 = arith.addf %27, %30 : vector<1x128xf32>
    %c1_15 = arith.constant 1 : index
    %32 = memref.load %arg3[%c1_15] : memref<8xf32, #tpu.memory_space<smem>>
    %33 = vector.broadcast %32 : f32 to vector<1x128xf32>
    %34 = arith.addf %31, %33 : vector<1x128xf32>
    %cst_16 = arith.constant 0.000000e+00 : f32
    %35 = vector.broadcast %cst_16 : f32 to vector<1x128xf32>
    %36 = arith.maximumf %34, %35 : vector<1x128xf32>
    %c1_17 = arith.constant 1 : index
    %c0_18 = arith.constant 0 : index
    %37 = memref.load %arg4[%c1_17, %c0_18] : memref<8x2xf32, #tpu.memory_space<smem>>
    %38 = vector.broadcast %37 : f32 to vector<1x128xf32>
    %39 = arith.mulf %38, %36 : vector<1x128xf32>
    %40 = arith.addf %20, %39 : vector<1x128xf32>
    %c1_19 = arith.constant 1 : index
    %c1_20 = arith.constant 1 : index
    %41 = memref.load %arg4[%c1_19, %c1_20] : memref<8x2xf32, #tpu.memory_space<smem>>
    %42 = vector.broadcast %41 : f32 to vector<1x128xf32>
    %43 = arith.mulf %42, %36 : vector<1x128xf32>
    %44 = arith.addf %24, %43 : vector<1x128xf32>
    %c0_21 = arith.constant 0 : index
    %c2 = arith.constant 2 : index
    %45 = memref.load %arg2[%c0_21, %c2] : memref<2x8xf32, #tpu.memory_space<smem>>
    %46 = vector.broadcast %45 : f32 to vector<1x128xf32>
    %47 = arith.mulf %46, %1 : vector<1x128xf32>
    %c1_22 = arith.constant 1 : index
    %c2_23 = arith.constant 2 : index
    %48 = memref.load %arg2[%c1_22, %c2_23] : memref<2x8xf32, #tpu.memory_space<smem>>
    %49 = vector.broadcast %48 : f32 to vector<1x128xf32>
    %50 = arith.mulf %49, %2 : vector<1x128xf32>
    %51 = arith.addf %47, %50 : vector<1x128xf32>
    %c2_24 = arith.constant 2 : index
    %52 = memref.load %arg3[%c2_24] : memref<8xf32, #tpu.memory_space<smem>>
    %53 = vector.broadcast %52 : f32 to vector<1x128xf32>
    %54 = arith.addf %51, %53 : vector<1x128xf32>
    %cst_25 = arith.constant 0.000000e+00 : f32
    %55 = vector.broadcast %cst_25 : f32 to vector<1x128xf32>
    %56 = arith.maximumf %54, %55 : vector<1x128xf32>
    %c2_26 = arith.constant 2 : index
    %c0_27 = arith.constant 0 : index
    %57 = memref.load %arg4[%c2_26, %c0_27] : memref<8x2xf32, #tpu.memory_space<smem>>
    %58 = vector.broadcast %57 : f32 to vector<1x128xf32>
    %59 = arith.mulf %58, %56 : vector<1x128xf32>
    %60 = arith.addf %40, %59 : vector<1x128xf32>
    %c2_28 = arith.constant 2 : index
    %c1_29 = arith.constant 1 : index
    %61 = memref.load %arg4[%c2_28, %c1_29] : memref<8x2xf32, #tpu.memory_space<smem>>
    %62 = vector.broadcast %61 : f32 to vector<1x128xf32>
    %63 = arith.mulf %62, %56 : vector<1x128xf32>
    %64 = arith.addf %44, %63 : vector<1x128xf32>
    %c0_30 = arith.constant 0 : index
    %c3 = arith.constant 3 : index
    %65 = memref.load %arg2[%c0_30, %c3] : memref<2x8xf32, #tpu.memory_space<smem>>
    %66 = vector.broadcast %65 : f32 to vector<1x128xf32>
    %67 = arith.mulf %66, %1 : vector<1x128xf32>
    %c1_31 = arith.constant 1 : index
    %c3_32 = arith.constant 3 : index
    %68 = memref.load %arg2[%c1_31, %c3_32] : memref<2x8xf32, #tpu.memory_space<smem>>
    %69 = vector.broadcast %68 : f32 to vector<1x128xf32>
    %70 = arith.mulf %69, %2 : vector<1x128xf32>
    %71 = arith.addf %67, %70 : vector<1x128xf32>
    %c3_33 = arith.constant 3 : index
    %72 = memref.load %arg3[%c3_33] : memref<8xf32, #tpu.memory_space<smem>>
    %73 = vector.broadcast %72 : f32 to vector<1x128xf32>
    %74 = arith.addf %71, %73 : vector<1x128xf32>
    %cst_34 = arith.constant 0.000000e+00 : f32
    %75 = vector.broadcast %cst_34 : f32 to vector<1x128xf32>
    %76 = arith.maximumf %74, %75 : vector<1x128xf32>
    %c3_35 = arith.constant 3 : index
    %c0_36 = arith.constant 0 : index
    %77 = memref.load %arg4[%c3_35, %c0_36] : memref<8x2xf32, #tpu.memory_space<smem>>
    %78 = vector.broadcast %77 : f32 to vector<1x128xf32>
    %79 = arith.mulf %78, %76 : vector<1x128xf32>
    %80 = arith.addf %60, %79 : vector<1x128xf32>
    %c3_37 = arith.constant 3 : index
    %c1_38 = arith.constant 1 : index
    %81 = memref.load %arg4[%c3_37, %c1_38] : memref<8x2xf32, #tpu.memory_space<smem>>
    %82 = vector.broadcast %81 : f32 to vector<1x128xf32>
    %83 = arith.mulf %82, %76 : vector<1x128xf32>
    %84 = arith.addf %64, %83 : vector<1x128xf32>
    %c0_39 = arith.constant 0 : index
    %c4 = arith.constant 4 : index
    %85 = memref.load %arg2[%c0_39, %c4] : memref<2x8xf32, #tpu.memory_space<smem>>
    %86 = vector.broadcast %85 : f32 to vector<1x128xf32>
    %87 = arith.mulf %86, %1 : vector<1x128xf32>
    %c1_40 = arith.constant 1 : index
    %c4_41 = arith.constant 4 : index
    %88 = memref.load %arg2[%c1_40, %c4_41] : memref<2x8xf32, #tpu.memory_space<smem>>
    %89 = vector.broadcast %88 : f32 to vector<1x128xf32>
    %90 = arith.mulf %89, %2 : vector<1x128xf32>
    %91 = arith.addf %87, %90 : vector<1x128xf32>
    %c4_42 = arith.constant 4 : index
    %92 = memref.load %arg3[%c4_42] : memref<8xf32, #tpu.memory_space<smem>>
    %93 = vector.broadcast %92 : f32 to vector<1x128xf32>
    %94 = arith.addf %91, %93 : vector<1x128xf32>
    %cst_43 = arith.constant 0.000000e+00 : f32
    %95 = vector.broadcast %cst_43 : f32 to vector<1x128xf32>
    %96 = arith.maximumf %94, %95 : vector<1x128xf32>
    %c4_44 = arith.constant 4 : index
    %c0_45 = arith.constant 0 : index
    %97 = memref.load %arg4[%c4_44, %c0_45] : memref<8x2xf32, #tpu.memory_space<smem>>
    %98 = vector.broadcast %97 : f32 to vector<1x128xf32>
    %99 = arith.mulf %98, %96 : vector<1x128xf32>
    %100 = arith.addf %80, %99 : vector<1x128xf32>
    %c4_46 = arith.constant 4 : index
    %c1_47 = arith.constant 1 : index
    %101 = memref.load %arg4[%c4_46, %c1_47] : memref<8x2xf32, #tpu.memory_space<smem>>
    %102 = vector.broadcast %101 : f32 to vector<1x128xf32>
    %103 = arith.mulf %102, %96 : vector<1x128xf32>
    %104 = arith.addf %84, %103 : vector<1x128xf32>
    %c0_48 = arith.constant 0 : index
    %c5 = arith.constant 5 : index
    %105 = memref.load %arg2[%c0_48, %c5] : memref<2x8xf32, #tpu.memory_space<smem>>
    %106 = vector.broadcast %105 : f32 to vector<1x128xf32>
    %107 = arith.mulf %106, %1 : vector<1x128xf32>
    %c1_49 = arith.constant 1 : index
    %c5_50 = arith.constant 5 : index
    %108 = memref.load %arg2[%c1_49, %c5_50] : memref<2x8xf32, #tpu.memory_space<smem>>
    %109 = vector.broadcast %108 : f32 to vector<1x128xf32>
    %110 = arith.mulf %109, %2 : vector<1x128xf32>
    %111 = arith.addf %107, %110 : vector<1x128xf32>
    %c5_51 = arith.constant 5 : index
    %112 = memref.load %arg3[%c5_51] : memref<8xf32, #tpu.memory_space<smem>>
    %113 = vector.broadcast %112 : f32 to vector<1x128xf32>
    %114 = arith.addf %111, %113 : vector<1x128xf32>
    %cst_52 = arith.constant 0.000000e+00 : f32
    %115 = vector.broadcast %cst_52 : f32 to vector<1x128xf32>
    %116 = arith.maximumf %114, %115 : vector<1x128xf32>
    %c5_53 = arith.constant 5 : index
    %c0_54 = arith.constant 0 : index
    %117 = memref.load %arg4[%c5_53, %c0_54] : memref<8x2xf32, #tpu.memory_space<smem>>
    %118 = vector.broadcast %117 : f32 to vector<1x128xf32>
    %119 = arith.mulf %118, %116 : vector<1x128xf32>
    %120 = arith.addf %100, %119 : vector<1x128xf32>
    %c5_55 = arith.constant 5 : index
    %c1_56 = arith.constant 1 : index
    %121 = memref.load %arg4[%c5_55, %c1_56] : memref<8x2xf32, #tpu.memory_space<smem>>
    %122 = vector.broadcast %121 : f32 to vector<1x128xf32>
    %123 = arith.mulf %122, %116 : vector<1x128xf32>
    %124 = arith.addf %104, %123 : vector<1x128xf32>
    %c0_57 = arith.constant 0 : index
    %c6 = arith.constant 6 : index
    %125 = memref.load %arg2[%c0_57, %c6] : memref<2x8xf32, #tpu.memory_space<smem>>
    %126 = vector.broadcast %125 : f32 to vector<1x128xf32>
    %127 = arith.mulf %126, %1 : vector<1x128xf32>
    %c1_58 = arith.constant 1 : index
    %c6_59 = arith.constant 6 : index
    %128 = memref.load %arg2[%c1_58, %c6_59] : memref<2x8xf32, #tpu.memory_space<smem>>
    %129 = vector.broadcast %128 : f32 to vector<1x128xf32>
    %130 = arith.mulf %129, %2 : vector<1x128xf32>
    %131 = arith.addf %127, %130 : vector<1x128xf32>
    %c6_60 = arith.constant 6 : index
    %132 = memref.load %arg3[%c6_60] : memref<8xf32, #tpu.memory_space<smem>>
    %133 = vector.broadcast %132 : f32 to vector<1x128xf32>
    %134 = arith.addf %131, %133 : vector<1x128xf32>
    %cst_61 = arith.constant 0.000000e+00 : f32
    %135 = vector.broadcast %cst_61 : f32 to vector<1x128xf32>
    %136 = arith.maximumf %134, %135 : vector<1x128xf32>
    %c6_62 = arith.constant 6 : index
    %c0_63 = arith.constant 0 : index
    %137 = memref.load %arg4[%c6_62, %c0_63] : memref<8x2xf32, #tpu.memory_space<smem>>
    %138 = vector.broadcast %137 : f32 to vector<1x128xf32>
    %139 = arith.mulf %138, %136 : vector<1x128xf32>
    %140 = arith.addf %120, %139 : vector<1x128xf32>
    %c6_64 = arith.constant 6 : index
    %c1_65 = arith.constant 1 : index
    %141 = memref.load %arg4[%c6_64, %c1_65] : memref<8x2xf32, #tpu.memory_space<smem>>
    %142 = vector.broadcast %141 : f32 to vector<1x128xf32>
    %143 = arith.mulf %142, %136 : vector<1x128xf32>
    %144 = arith.addf %124, %143 : vector<1x128xf32>
    %c0_66 = arith.constant 0 : index
    %c7 = arith.constant 7 : index
    %145 = memref.load %arg2[%c0_66, %c7] : memref<2x8xf32, #tpu.memory_space<smem>>
    %146 = vector.broadcast %145 : f32 to vector<1x128xf32>
    %147 = arith.mulf %146, %1 : vector<1x128xf32>
    %c1_67 = arith.constant 1 : index
    %c7_68 = arith.constant 7 : index
    %148 = memref.load %arg2[%c1_67, %c7_68] : memref<2x8xf32, #tpu.memory_space<smem>>
    %149 = vector.broadcast %148 : f32 to vector<1x128xf32>
    %150 = arith.mulf %149, %2 : vector<1x128xf32>
    %151 = arith.addf %147, %150 : vector<1x128xf32>
    %c7_69 = arith.constant 7 : index
    %152 = memref.load %arg3[%c7_69] : memref<8xf32, #tpu.memory_space<smem>>
    %153 = vector.broadcast %152 : f32 to vector<1x128xf32>
    %154 = arith.addf %151, %153 : vector<1x128xf32>
    %cst_70 = arith.constant 0.000000e+00 : f32
    %155 = vector.broadcast %cst_70 : f32 to vector<1x128xf32>
    %156 = arith.maximumf %154, %155 : vector<1x128xf32>
    %c7_71 = arith.constant 7 : index
    %c0_72 = arith.constant 0 : index
    %157 = memref.load %arg4[%c7_71, %c0_72] : memref<8x2xf32, #tpu.memory_space<smem>>
    %158 = vector.broadcast %157 : f32 to vector<1x128xf32>
    %159 = arith.mulf %158, %156 : vector<1x128xf32>
    %160 = arith.addf %140, %159 : vector<1x128xf32>
    %c7_73 = arith.constant 7 : index
    %c1_74 = arith.constant 1 : index
    %161 = memref.load %arg4[%c7_73, %c1_74] : memref<8x2xf32, #tpu.memory_space<smem>>
    %162 = vector.broadcast %161 : f32 to vector<1x128xf32>
    %163 = arith.mulf %162, %156 : vector<1x128xf32>
    %164 = arith.addf %144, %163 : vector<1x128xf32>
    %c0_75 = arith.constant 0 : index
    %165 = memref.load %arg5[%c0_75] : memref<2xf32, #tpu.memory_space<smem>>
    %166 = vector.broadcast %165 : f32 to vector<1x128xf32>
    %167 = arith.addf %160, %166 : vector<1x128xf32>
    %c1_76 = arith.constant 1 : index
    %168 = memref.load %arg5[%c1_76] : memref<2xf32, #tpu.memory_space<smem>>
    %169 = vector.broadcast %168 : f32 to vector<1x128xf32>
    %170 = arith.addf %164, %169 : vector<1x128xf32>
    %171 = arith.maximumf %167, %170 : vector<1x128xf32>
    %172 = arith.subf %167, %171 : vector<1x128xf32>
    %173 = math.exp %172 : vector<1x128xf32>
    %174 = arith.subf %170, %171 : vector<1x128xf32>
    %175 = math.exp %174 : vector<1x128xf32>
    %176 = arith.addf %173, %175 : vector<1x128xf32>
    %177 = math.log %176 : vector<1x128xf32>
    %178 = arith.subf %167, %171 : vector<1x128xf32>
    %179 = arith.subf %178, %177 : vector<1x128xf32>
    %c0_77 = arith.constant 0 : index
    %c0_78 = arith.constant 0 : index
    %180 = vector.load %arg6[%c0_77, %c0_78] : memref<2x128xf32, #tpu.memory_space<vmem>>, vector<1x128xf32>
    tpu.vector_store %arg6[%c0_77, %c0_78], %179 {strides = array<i32>} : memref<2x128xf32, #tpu.memory_space<vmem>>, vector<1x128xf32>,
    %181 = arith.subf %170, %171 : vector<1x128xf32>
    %182 = arith.subf %181, %177 : vector<1x128xf32>
    %c1_79 = arith.constant 1 : index
    %c0_80 = arith.constant 0 : index
    %183 = vector.load %arg6[%c1_79, %c0_80] : memref<2x128xf32, #tpu.memory_space<vmem>>, vector<1x128xf32>
    tpu.vector_store %arg6[%c1_79, %c0_80], %182 {strides = array<i32>} : memref<2x128xf32, #tpu.memory_space<vmem>>, vector<1x128xf32>,
    return
  }
  func.func @transform_0(%arg0: i32) -> (i32, i32) {
    %c0_i32 = arith.constant 0 : i32
    %c0_i32_0 = arith.constant 0 : i32
    return %c0_i32, %arg0 : i32, i32
  }
  func.func @transform_1(%arg0: i32) -> (i32, i32) {
    %c0_i32 = arith.constant 0 : i32
    %c0_i32_0 = arith.constant 0 : i32
    %c0_i32_1 = arith.constant 0 : i32
    return %c0_i32, %c0_i32_0 : i32, i32
  }
  func.func @transform_2(%arg0: i32) -> i32 {
    %c0_i32 = arith.constant 0 : i32
    %c0_i32_0 = arith.constant 0 : i32
    return %c0_i32 : i32
  }
  func.func @transform_3(%arg0: i32) -> (i32, i32) {
    %c0_i32 = arith.constant 0 : i32
    %c0_i32_0 = arith.constant 0 : i32
    %c0_i32_1 = arith.constant 0 : i32
    return %c0_i32, %c0_i32_0 : i32, i32
  }
  func.func @transform_4(%arg0: i32) -> i32 {
    %c0_i32 = arith.constant 0 : i32
    %c0_i32_0 = arith.constant 0 : i32
    return %c0_i32 : i32
  }
  func.func @transform_5(%arg0: i32) -> (i32, i32) {
    %c0_i32 = arith.constant 0 : i32
    %c0_i32_0 = arith.constant 0 : i32
    return %c0_i32, %arg0 : i32, i32
  }
}

</mosaic_0001>

<bundles_post_ra>
// kernel: tpu_custom_call.1
= control target key start
LH: loop header
LB: loop body
LE: loop exit
PB: predicated region body
PF: predicated region fallthrough
CT: control target
= control target key end

     0   :  { %10 = vsyncpa [#allocation4], 0  ;;  %s586_s0 = inlined_call_operand.vmem [shape: f32[2,128], index: 0, kind: input, shape index: {}]   ;;  %s587_s1 = inlined_call_operand.vmem [shape: f32[2,8], index: 1, kind: input, shape index: {}]   ;;  %s588_s2 = inlined_call_operand.vmem [shape: f32[8], index: 2, kind: input, shape index: {}]   ;;  %s589_s3 = inlined_call_operand.vmem [shape: f32[8,2], index: 3, kind: input, shape index: {}]   ;;  %s590_s4 = inlined_call_operand.vmem [shape: f32[2], index: 4, kind: input, shape index: {}]   ;;  %s591_s5 = inlined_call_operand.hbm [shape: f32[2,128], index: 5, kind: output, shape index: {}]  }
   0x1   :  { %11 = vsyncpa [#allocation6], 0 }
   0x2   :  { %12 = vsyncpa [#allocation9], 0  ;;  %s32_s20 = sshll.u32 %s588_s2, 4  ;;  %s33_s20 = int_to_ptr.vmem [resolvable:$true] %s32_s20 }
   0x3   :  { %13 = vsyncpa [#allocation3], 0  ;;  %s22_s23 = sshll.u32 %s587_s1, 4  ;;  %s332_s24 = scalar_lea.vmem %s33_s20, 16  ;;  %s23_s23 = int_to_ptr.vmem [resolvable:$true] %s22_s23 }
   0x4   :  { %p333_p0 = scmp.ne.s32.totalorder %s33_s20, %s332_s24  ;;  %p337_p1 = scmp.lt.s32.totalorder %s33_s20, %s33_s20 }
   0x5   :  { %p338_p2 = scmp.lt.s32.totalorder %s332_s24, %s332_s24 }
   0x7   :  { %p339_p3 = por %p338_p2, %p337_p1 }
   0x9   :  { %p340_p4 = pnand %p339_p3, %p333_p0 }
   0xb   :  { %343 = shalt.err (!%p340_p4)
}
   0xc   :  { %s410_s25 = smov [#allocation5]   ;;  %s344_s26 = scalar_lea.vmem %s23_s23, 32 }
   0xd   :  { %35 = dma.vmem_to_smem %s33_s20, 16, %s410_s25, [#allocation6]  }
   0xe   :  { %p345_p5 = scmp.ne.s32.totalorder %s23_s23, %s344_s26  ;;  %p349_p6 = scmp.lt.s32.totalorder %s23_s23, %s23_s23 }
   0xf   :  { %p350_p7 = scmp.lt.s32.totalorder %s344_s26, %s344_s26 }
  0x11   :  { %p351_p8 = por %p350_p7, %p349_p6 }
  0x13   :  { %p352_p9 = pnand %p351_p8, %p345_p5 }
  0x15   :  { %355 = shalt.err (!%p352_p9)
}
  0x16   :  { %s411_s2 = smov [#allocation2]   ;;  %s42_s28 = sshll.u32 %s589_s3, 4  ;;  %s43_s28 = int_to_ptr.vmem [resolvable:$true] %s42_s28 }
  0x17   :  { %25 = dma.vmem_to_smem %s23_s23, 32, %s411_s2, [#allocation4]  }
  0x18   :  { %s52_s6 = sshll.u32 %s590_s4, 4  ;;  %s356_s7 = scalar_lea.vmem %s43_s28, 128  ;;  %s53_s6 = int_to_ptr.vmem [resolvable:$true] %s52_s6 }
  0x19   :  { %p357_p10 = scmp.ne.s32.totalorder %s43_s28, %s356_s7  ;;  %p361_p11 = scmp.lt.s32.totalorder %s43_s28, %s43_s28 }
  0x1a   :  { %p362_p12 = scmp.lt.s32.totalorder %s356_s7, %s356_s7 }
  0x1c   :  { %p363_p13 = por %p362_p12, %p361_p11 }
  0x1e   :  { %p364_p0 = pnand %p363_p13, %p357_p10 }
  0x20   :  { %367 = shalt.err (!%p364_p0)
}
  0x21   :  { %s412_s8 = smov [#allocation7]   ;;  %s368_s9 = scalar_lea.vmem %s53_s6, 16 }
  0x22   :  { %45 = dma.vmem_to_smem %s43_s28, 128, %s412_s8, [#allocation6]  }
  0x23   :  { %p369_p1 = scmp.ne.s32.totalorder %s53_s6, %s368_s9  ;;  %p373_p2 = scmp.lt.s32.totalorder %s53_s6, %s53_s6 }
  0x24   :  { %p374_p3 = scmp.lt.s32.totalorder %s368_s9, %s368_s9 }
  0x26   :  { %p375_p4 = por %p374_p3, %p373_p2 }
  0x28   :  { %p376_p5 = pnand %p375_p4, %p369_p1 }
  0x2a   :  { %379 = shalt.err (!%p376_p5)
}
  0x2b   :  { %s413_s3 = smov [#allocation8]  }
  0x2c   :  { %55 = dma.vmem_to_smem %s53_s6, 16, %s413_s3, [#allocation9]  }
  0x2d   :  { %402 = dma.done.wait [#allocation4], 32  }
  0x2e   :  { %403 = vsyncadd [#allocation4], 4294967264 }
  0x2f   :  { %404 = dma.done.wait [#allocation6], 144  }
  0x30   :  { %405 = vsyncadd [#allocation6], 4294967152 }
  0x31   :  { %406 = dma.done.wait [#allocation9], 16  }
  0x32   :  { %407 = vsyncadd [#allocation9], 4294967280 }
  0x33   :  { %68 = sfence }
  0x34   :  { %s70_s4 = sld [smem:[#allocation2]]  ;;  %s461_s13 = sld [smem:[#allocation7 + $0x1]]  ;;  %v468_v0 = vld [vmem:[%s586_s0] sm:$0x3] }
  0x35   :  { %s283_s10 = sld [smem:[#allocation2 + $0x80]]  ;;  %s285_s14 = sld [smem:[#allocation2 + $0x1]] }
  0x36   :  { %s457_s11 = sld [smem:[#allocation5]]  ;;  %s286_s15 = sld [smem:[#allocation2 + $0x81]] }
  0x37   :  { %s459_s12 = sld [smem:[#allocation7]]  ;;  %s463_s16 = sld [smem:[#allocation5 + $0x1]] }
  0x38   :  { %s470_s19 = sld [smem:[#allocation7 + $0x80]]  ;;  %s472_s20 = sld [smem:[#allocation7 + $0x81]] }
  0x39   :  { %s290_s21 = sld [smem:[#allocation2 + $0x2]]  ;;  %s478_s24 = sld [smem:[#allocation7 + $0x100]] }
  0x3a   :  { %s291_s22 = sld [smem:[#allocation2 + $0x82]]  ;;  %v71_v1 = vstv %s70_s4  ;;  %s480_s0 = sld [smem:[#allocation2 + $0x3]]  ;;  %v89_v13 = vstv %s461_s13 }
  0x3b   :  { %v74_v2 = vstv %s283_s10  ;;  %s474_s23 = sld [smem:[#allocation5 + $0x2]]  ;;  %v72_v3 = vmul.f32 %v71_v1, %v468_v0  ;;  %v93_v5 = vstv %s285_s14  ;;  %s482_s25 = sld [smem:[#allocation7 + $0x101]] }
  0x3c   :  { %v75_v4 = vmul.f32 %v74_v2, %v468_v0  ;;  %s484_s26 = sld [smem:[#allocation2 + $0x83]]  ;;  %v96_v7 = vstv %s286_s15  ;;  %s488_s1 = sld [smem:[#allocation7 + $0x180]]  ;;  %v81_v8 = vstv %s457_s11  ;;  %v94_v10 = vmul.f32 %v93_v5, %v468_v0 }
  0x3d   :  { %s486_s2 = sld [smem:[#allocation5 + $0x3]]  ;;  %v85_v9 = vstv %s459_s12  ;;  %v97_v11 = vmul.f32 %v96_v7, %v468_v0  ;;  %s494_s27 = sld [smem:[#allocation2 + $0x4]]  ;;  %v103_v17 = vstv %s463_s16 }
  0x3e   :  { %v77_v6 = vrot.slane %v75_v4, 1  ;;  %s496_s28 = sld [smem:[#allocation2 + $0x84]]  ;;  %s499_s29 = sld [smem:[#allocation7 + $0x181]]  ;;  %v107_v21 = vstv %s470_s19  ;;  %v111_v22 = vstv %s472_s20 }
  0x3f   :  { %v115_v14 = vstv %s290_s21  ;;  %v99_v16 = vrot.slane %v97_v11, 1  ;;  %s504_s30 = sld [smem:[#allocation2 + $0x5]]  ;;  %s509_s6 = sld [smem:[#allocation5 + $0x4]]  ;;  %v129_v29 = vstv %s478_s24 }
  0x40   :  { %v79_v12 = vadd.f32 %v77_v6, %v72_v3  ;;  %v118_v15 = vstv %s291_s22  ;;  %v116_v18 = vmul.f32 %v115_v14, %v468_v0  ;;  %v137_v23 = vstv %s480_s0  ;;  %s511_s7 = sld [smem:[#allocation2 + $0x85]]  ;;  %s520_s8 = sld [smem:[#allocation7 + $0x200]] }
  0x41   :  { %v119_v19 = vmul.f32 %v118_v15, %v468_v0  ;;  %v101_v24 = vadd.f32 %v99_v16, %v94_v10  ;;  %v125_v26 = vstv %s474_s23  ;;  %v138_v30 = vmul.f32 %v137_v23, %v468_v0  ;;  %s524_s9 = sld [smem:[#allocation7 + $0x201]]  ;;  %s526_s3 = sld [smem:[#allocation5 + $0x5]] }
  0x42   :  { %v82_v20 = vadd.f32 %v81_v8, %v79_v12  ;;  %v140_v27 = vstv %s484_s26  ;;  %v133_v34 = vstv %s482_s25  ;;  %v151_v39 = vstv %s488_s1  ;;  %s529_s4 = sld [smem:[#allocation2 + $0x6]]  ;;  %s537_s11 = sld [smem:[#allocation2 + $0x7]] }
  0x43   :  { %v121_v25 = vrot.slane %v119_v19, 1  ;;  %v141_v31 = vmul.f32 %v140_v27, %v468_v0  ;;  %v104_v32 = vadd.f32 %v103_v17, %v101_v24  ;;  %v159_v35 = vstv %s494_s27  ;;  %s531_s10 = sld [smem:[#allocation2 + $0x86]]  ;;  %s541_s12 = sld [smem:[#allocation7 + $0x280]] }
  0x44   :  { %v83_v28 = vmax.f32 %v82_v20, 0.0  ;;  %v147_v38 = vstv %s486_s2  ;;  %v162_v43 = vstv %s496_s28  ;;  %v155_v45 = vstv %s499_s29  ;;  %s543_s13 = sld [smem:[#allocation7 + $0x281]]  ;;  %s545_s14 = sld [smem:[#allocation2 + $0x87]] }
  0x45   :  { %v123_v33 = vadd.f32 %v121_v25, %v116_v18  ;;  %v143_v37 = vrot.slane %v141_v31, 1  ;;  %v105_v41 = vmax.f32 %v104_v32, 0.0  ;;  %v160_v46 = vmul.f32 %v159_v35, %v468_v0  ;;  %s549_s15 = sld [smem:[#allocation5 + $0x6]]  ;;  %s556_s16 = sld [smem:[#allocation5 + $0x7]] }
  0x46   :  { %v86_v36 = vmul.f32 %v85_v9, %v83_v28  ;;  %v90_v40 = vmul.f32 %v89_v13, %v83_v28  ;;  %v163_v47 = vmul.f32 %v162_v43, %v468_v0  ;;  %v181_v51 = vstv %s504_s30  ;;  %s558_s17 = sld [smem:[#allocation7 + $0x300]]  ;;  %s560_s18 = sld [smem:[#allocation7 + $0x301]] }
  0x47   :  { %v126_v42 = vadd.f32 %v125_v26, %v123_v33  ;;  %v145_v44 = vadd.f32 %v143_v37, %v138_v30  ;;  %v108_v48 = vmul.f32 %v107_v21, %v105_v41  ;;  %v112_v49 = vmul.f32 %v111_v22, %v105_v41  ;;  %s318_s19 = sld [smem:[#allocation7 + $0x380]]  ;;  %s319_s20 = sld [smem:[#allocation7 + $0x381]] }
  0x48   :  { %v165_v53 = vrot.slane %v163_v47, 1  ;;  %v169_v54 = vstv %s509_s6  ;;  %v184_v55 = vstv %s511_s7  ;;  %v182_v62 = vmul.f32 %v181_v51, %v468_v0  ;;  %s246_s21 = sld [smem:[#allocation8]]  ;;  %s320_s22 = sld [smem:[#allocation8 + $0x1]] }
  0x49   :  { %v127_v50 = vmax.f32 %v126_v42, 0.0  ;;  %v148_v52 = vadd.f32 %v147_v38, %v145_v44  ;;  %v109_v56 = vadd.f32 %v108_v48, %v86_v36  ;;  %v113_v57 = vadd.f32 %v112_v49, %v90_v40  ;;  %s414_s23 = smov [#allocation10]  }
  0x4a   :  { %v167_v61 = vadd.f32 %v165_v53, %v160_v46  ;;  %v185_v63 = vmul.f32 %v184_v55, %v468_v0  ;;  %v173_v3 = vstv %s520_s8  ;;  %v177_v8 = vstv %s524_s9  ;;  %s272_s24 = sshll.u32 %s414_s23, 4  ;;  %s273_s24 = int_to_ptr.vmem [resolvable:$true] %s272_s24 }
  0x4b   :  { %v130_v58 = vmul.f32 %v129_v29, %v127_v50  ;;  %v134_v59 = vmul.f32 %v133_v34, %v127_v50  ;;  %v149_v60 = vmax.f32 %v148_v52, 0.0  ;;  %v191_v9 = vstv %s526_s3  ;;  %s380_s0 = scalar_lea.vmem %s273_s24, 32  ;;  %p385_p7 = scmp.lt.s32.totalorder %s273_s24, %s273_s24 }
  0x4c   :  { %v170_v6 = vadd.f32 %v169_v54, %v167_v61  ;;  %v187_v7 = vrot.slane %v185_v63, 1  ;;  %v203_v10 = vstv %s529_s4  ;;  %v206_v11 = vstv %s531_s10  ;;  %p381_p6 = scmp.ne.s32.totalorder %s273_s24, %s380_s0  ;;  %p386_p8 = scmp.lt.s32.totalorder %s380_s0, %s380_s0 }
  0x4d   :  { %v131_v1 = vadd.f32 %v130_v58, %v109_v56  ;;  %v135_v2 = vadd.f32 %v134_v59, %v113_v57  ;;  %v152_v4 = vmul.f32 %v151_v39, %v149_v60  ;;  %v156_v5 = vmul.f32 %v155_v45, %v149_v60 }
  0x4e   :  { %v171_v13 = vmax.f32 %v170_v6, 0.0  ;;  %v189_v14 = vadd.f32 %v187_v7, %v182_v62  ;;  %v204_v16 = vmul.f32 %v203_v10, %v468_v0  ;;  %v207_v17 = vmul.f32 %v206_v11, %v468_v0  ;;  %p387_p9 = por %p386_p8, %p385_p7 }
  0x4f   :  { %v153_v12 = vadd.f32 %v152_v4, %v131_v1  ;;  %v157_v15 = vadd.f32 %v156_v5, %v135_v2  ;;  %v225_v18 = vstv %s537_s11  ;;  %v195_v22 = vstv %s541_s12 }
  0x50   :  { %v174_v19 = vmul.f32 %v173_v3, %v171_v13  ;;  %v178_v20 = vmul.f32 %v177_v8, %v171_v13  ;;  %v192_v21 = vadd.f32 %v191_v9, %v189_v14  ;;  %v199_v23 = vstv %s543_s13  ;;  %p388_p10 = pnand %p387_p9, %p381_p6 }
  0x51   :  { %v209_v24 = vrot.slane %v207_v17, 1  ;;  %v228_v25 = vstv %s545_s14  ;;  %v213_v27 = vstv %s549_s15  ;;  %v226_v28 = vmul.f32 %v225_v18, %v468_v0 }
  0x52   :  { %v193_v26 = vmax.f32 %v192_v21, 0.0  ;;  %v229_v29 = vmul.f32 %v228_v25, %v468_v0  ;;  %v175_v30 = vadd.f32 %v174_v19, %v153_v12  ;;  %v179_v31 = vadd.f32 %v178_v20, %v157_v15 }
  0x53   :  { %v211_v32 = vadd.f32 %v209_v24, %v204_v16  ;;  %v235_v37 = vstv %s556_s16  ;;  %v217_v38 = vstv %s558_s17  ;;  %v221_v39 = vstv %s560_s18 }
  0x54   :  { %v196_v33 = vmul.f32 %v195_v22, %v193_v26  ;;  %v200_v34 = vmul.f32 %v199_v23, %v193_v26  ;;  %v231_v35 = vrot.slane %v229_v29, 1  ;;  %v239_v0 = vstv %s318_s19 }
  0x55   :  { %v214_v36 = vadd.f32 %v213_v27, %v211_v32  ;;  %v243_v47 = vstv %s319_s20  ;;  %v247_v53 = vstv %s246_s21  ;;  %v250_v54 = vstv %s320_s22 }
  0x56   :  { %v233_v40 = vadd.f32 %v231_v35, %v226_v28  ;;  %v197_v41 = vadd.f32 %v196_v33, %v175_v30  ;;  %v201_v42 = vadd.f32 %v200_v34, %v179_v31 }
  0x57   :  { %v215_v43 = vmax.f32 %v214_v36, 0.0 }
  0x58   :  { %v236_v44 = vadd.f32 %v235_v37, %v233_v40 }
  0x59   :  { %v218_v45 = vmul.f32 %v217_v38, %v215_v43  ;;  %v222_v46 = vmul.f32 %v221_v39, %v215_v43 }
  0x5a   :  { %v237_v48 = vmax.f32 %v236_v44, 0.0 }
  0x5b   :  { %v219_v49 = vadd.f32 %v218_v45, %v197_v41  ;;  %v223_v50 = vadd.f32 %v222_v46, %v201_v42 }
  0x5c   :  { %v240_v51 = vmul.f32 %v239_v0, %v237_v48  ;;  %v244_v52 = vmul.f32 %v243_v47, %v237_v48 }
  0x5e   :  { %v241_v55 = vadd.f32 %v240_v51, %v219_v49  ;;  %v245_v56 = vadd.f32 %v244_v52, %v223_v50 }
  0x60   :  { %v248_v57 = vadd.f32 %v247_v53, %v241_v55  ;;  %v251_v58 = vadd.f32 %v250_v54, %v245_v56 }
  0x62   :  { %v252_v59 = vmax.f32 %v248_v57, %v251_v58 }
  0x64   :  { %v253_v60 = vsub.f32 %v248_v57, %v252_v59  ;;  %v256_v61 = vsub.f32 %v251_v58, %v252_v59 }
  0x66   :  { %v254_v62 = vmul.f32 1.442695, %v253_v60  ;;  %v257_v63 = vmul.f32 1.442695, %v256_v61 }
  0x68   :  { %326 = vpow2.f32 %v254_v62 }
  0x69   :  { %328 = vpow2.f32 %v257_v63 }
  0x72   :  { %v327_v1 = vpop.eup %326 }
  0x73   :  { %v329_v2 = vpop.eup %328 }
  0x74   :  { %v259_v3 = vadd.f32 %v329_v2, %v327_v1 }
  0x76   :  { %330 = vlog2.f32 %v259_v3 }
  0x80   :  { %v331_v4 = vpop.eup %330 }
  0x81   :  { %v261_v5 = vmul.f32 0.6931472, %v331_v4 }
  0x83   :  { %v262_v6 = vsub.f32 %v253_v60, %v261_v5  ;;  %v264_v7 = vsub.f32 %v256_v61, %v261_v5 }
  0x85   :  { %263 = vst [vmem:[#allocation10] sm:$0x1] %v262_v6  ;;  %265 = vst [vmem:[#allocation10 + $0x1] sm:$0x1] %v264_v7 }
  0x86   :  { %391 = shalt.err (!%p388_p10)
}
  0x87   :  { %s392_s2 = scalar_lea.hbm %s591_s5, 32 }
  0x88   :  { %p393_p11 = scmp.ne.s32.totalorder %s591_s5, %s392_s2  ;;  %p396_p12 = scmp.lt.u32.totalorder %s392_s2, %s591_s5 }
  0x8a   :  { %p398_p13 = pnand %p396_p12, %p393_p11 }
  0x8c   :  { %401 = shalt.err (!%p398_p13)
}
  0x8d   :  { %275 = dma.vmem_to_hbm [thread:$0]  %s273_s24, 32, %s591_s5, [#allocation3]  }
  0x8e   :  { %408 = dma.done.wait [#allocation3], 32  }
  0x8f   :  { %409 = vsyncadd [#allocation3], 4294967264 }
  0x90   :  { %279 = vsyncpa [#allocation3], 1 }
  0x91   :  { %280 = vsyncpa [#allocation4], 1 }
  0x92   :  { %281 = vsyncpa [#allocation6], 1 }
  0x93   :  { %282 = vsyncpa [#allocation9], 1 }

</bundles_post_ra>
